<compile_context>
chip_gen: v5e
topology: v5e:2x2
jax: 0.10.0
libtpu: 0.0.40
codegen_flags: <defaults>
</compile_context>

<pallas_src>
import functools
import math

import jax
import jax.numpy as jnp
from jax.experimental import pallas as pl
from jax.experimental.pallas import tpu as pltpu


def _pe_kernel(a_ref, b_ref, out_ref, *, block_rows):
    """out[r, l] = sin(global_row(r) * a[l] + b[l])  -- 1 transcendental / elem."""
    i = pl.program_id(0)
    rblk, lanes = out_ref.shape
    row = (
        jax.lax.broadcasted_iota(jnp.int32, (rblk, lanes), 0) + i * block_rows
    ).astype(jnp.float32)
    # a/b are (1, lanes) and broadcast over the row (sublane) axis.
    out_ref[...] = jnp.sin(row * a_ref[...] + b_ref[...])


def _choose_block_rows(num_rows: int, lane_width: int,
                       max_block_bytes: int = 4 * 1024 * 1024) -> int:
    """Pick a row-tile: whole array if small, else a multiple of 8 rows <= ~4 MiB."""
    if num_rows * lane_width * 4 <= max_block_bytes:
        return num_rows
    tm = max_block_bytes // (lane_width * 4)
    tm = max(8, (tm // 8) * 8)
    return min(tm, num_rows)


def make_pe_table(max_len: int, emb_dim: int) -> jax.Array:
    """Build the (max_len, emb_dim) sinusoidal PE table with a Pallas kernel."""
    if emb_dim % 2 != 0:
        # The PyTorch module itself fails for odd emb_dim (shape mismatch on 1::2).
        raise ValueError("emb_dim must be even (matches PyTorch PositionalEncoding)")

    # --- choose a lane-dense output layout -------------------------------------
    if emb_dim % 128 == 0:
        # natural layout is already lane-dense
        rows, lanes = max_len, emb_dim
        pos_row_scale = 1
        lane = jnp.arange(lanes, dtype=jnp.int32)
        d_lane = lane
        pos_lane = jnp.zeros((lanes,), dtype=jnp.float32)
    elif (128 % emb_dim == 0) and ((max_len * emb_dim) % 128 == 0):
        # flatten: (max_len*emb_dim/128, 128) slab -> full-width stores
        rows, lanes = (max_len * emb_dim) // 128, 128
        pos_row_scale = 128 // emb_dim
        lane = jnp.arange(lanes, dtype=jnp.int32)
        d_lane = lane % emb_dim
        pos_lane = (lane // emb_dim).astype(jnp.float32)
    else:
        # fallback: correct but not lane-dense (masked stores)
        rows, lanes = max_len, emb_dim
        pos_row_scale = 1
        lane = jnp.arange(lanes, dtype=jnp.int32)
        d_lane = lane
        pos_lane = jnp.zeros((lanes,), dtype=jnp.float32)

    # --- tiny per-lane coefficient rows (exp / parity handled here, not in kernel)
    inv = jnp.float32(-math.log(10000.0) / emb_dim)
    k = ((d_lane // 2) * 2).astype(jnp.float32)
    freq = jnp.exp(k * inv)                                        # (lanes,)
    phase = (d_lane % 2).astype(jnp.float32) * jnp.float32(math.pi / 2)  # cos->sin
    a_row = (jnp.float32(pos_row_scale) * freq)[None, :]           # (1, lanes)
    b_row = (pos_lane * freq + phase)[None, :]                     # (1, lanes)

    block_rows = _choose_block_rows(rows, lanes)
    grid = (pl.cdiv(rows, block_rows),)

    table = pl.pallas_call(
        functools.partial(_pe_kernel, block_rows=block_rows),
        out_shape=jax.ShapeDtypeStruct((rows, lanes), jnp.float32),
        grid=grid,
        in_specs=[
            pl.BlockSpec((1, lanes), lambda i: (0, 0)),
            pl.BlockSpec((1, lanes), lambda i: (0, 0)),
        ],
        out_specs=pl.BlockSpec((block_rows, lanes), lambda i: (i, 0)),
        compiler_params=pltpu.CompilerParams(
            dimension_semantics=("parallel",),
        ),
    )(a_row, b_row)

    return table.reshape(max_len, emb_dim)


class PositionalEncoding:
    """JAX/Pallas equivalent of the PyTorch PositionalEncoding module."""

    def __init__(self, max_len: int, emb_dim: int):
        self.max_len = max_len
        self.emb_dim = emb_dim
        # pe is a fixed (non-trainable) buffer of shape (1, max_len, emb_dim)
        self.pe = make_pe_table(max_len, emb_dim)[None, :, :]

    def __call__(self, x: jax.Array) -> jax.Array:
        # forward: return pe[:, :x.size(1), :]
        seq_len = x.shape[1]
        return self.pe[:, :seq_len, :]


def _reference_pe(max_len: int, emb_dim: int) -> jnp.ndarray:
    """Plain-JAX reference mirroring the PyTorch __init__ math."""
    pos = jnp.arange(max_len, dtype=jnp.float32)[:, None]
    div_term = jnp.exp(
        jnp.arange(0, emb_dim, 2, dtype=jnp.float32) * (-math.log(10000.0) / emb_dim)
    )
    pe = jnp.zeros((max_len, emb_dim), dtype=jnp.float32)
    pe = pe.at[:, 0::2].set(jnp.sin(pos * div_term))
    pe = pe.at[:, 1::2].set(jnp.cos(pos * div_term))
    return pe[None, :, :]


if __name__ == "__main__":
    max_len, emb_dim = 64, 32
    batch, seq = 2, 8

    key = jax.random.PRNGKey(0)
    x = jax.random.normal(key, (batch, seq, emb_dim), dtype=jnp.float32)

    module = PositionalEncoding(max_len, emb_dim)
    out = module(x)
    out = jax.block_until_ready(out)

    assert out.shape == (1, seq, emb_dim), out.shape
    assert out.dtype == jnp.float32, out.dtype

    ref = _reference_pe(max_len, emb_dim)[:, :seq, :]
    # cos(x) = sin(x + pi/2) rewrite introduces ~ulp-level angle rounding, so
    # allow a slightly looser (still tight) tolerance than exact bitmatch.
    err = float(jnp.max(jnp.abs(out - ref)))
    if err > 1e-4:
        raise AssertionError(f"mismatch vs reference, max abs err = {err}")

    print("KERNEL_OK")
</pallas_src>

<mosaic_0001>
module attributes {stable_mosaic.version = 11 : i64} {
  func.func @_pe_kernel(%arg0: i32, %arg1: memref<1x128xf32, #tpu.memory_space<vmem>>, %arg2: memref<1x128xf32, #tpu.memory_space<vmem>>, %arg3: memref<16x128xf32, #tpu.memory_space<vmem>>) attributes {dimension_semantics = [#tpu.dimension_semantics<parallel>], iteration_bounds = array<i64: 1>, scalar_prefetch = 0 : i64, scratch_operands = 0 : i64, tpu.core_type = #tpu.core_type<tc>, window_params = [{pipeline_mode = #tpu.pipeline_mode<synchronous>, transform_indices = @transform_0, window_bounds = array<i64: 1, 128>}, {pipeline_mode = #tpu.pipeline_mode<synchronous>, transform_indices = @transform_1, window_bounds = array<i64: 1, 128>}, {transform_indices = @transform_2, window_bounds = array<i64: 16, 128>}]} {
    %0 = tpu.iota {dimensions = array<i32: 0>} : vector<16x128xi32>
    %c16_i32 = arith.constant 16 : i32
    %1 = arith.muli %arg0, %c16_i32 : i32
    %2 = vector.broadcast %1 : i32 to vector<16x128xi32>
    %3 = arith.addi %0, %2 : vector<16x128xi32>
    %4 = arith.sitofp %3 : vector<16x128xi32> to vector<16x128xf32>
    %c0 = arith.constant 0 : index
    %c0_0 = arith.constant 0 : index
    %5 = vector.load %arg1[%c0, %c0_0] : memref<1x128xf32, #tpu.memory_space<vmem>>, vector<1x128xf32>
    %6 = vector.broadcast %5 : vector<1x128xf32> to vector<16x128xf32>
    %7 = arith.mulf %4, %6 : vector<16x128xf32>
    %c0_1 = arith.constant 0 : index
    %c0_2 = arith.constant 0 : index
    %8 = vector.load %arg2[%c0_1, %c0_2] : memref<1x128xf32, #tpu.memory_space<vmem>>, vector<1x128xf32>
    %9 = vector.broadcast %8 : vector<1x128xf32> to vector<16x128xf32>
    %10 = arith.addf %7, %9 : vector<16x128xf32>
    %11 = math.sin %10 : vector<16x128xf32>
    %c0_3 = arith.constant 0 : index
    %c0_4 = arith.constant 0 : index
    %12 = vector.load %arg3[%c0_3, %c0_4] : memref<16x128xf32, #tpu.memory_space<vmem>>, vector<16x128xf32>
    tpu.vector_store %arg3[%c0_3, %c0_4], %11 {strides = array<i32>} : memref<16x128xf32, #tpu.memory_space<vmem>>, vector<16x128xf32>,
    return
  }
  func.func @transform_0(%arg0: i32) -> (i32, i32) {
    %c0_i32 = arith.constant 0 : i32
    %c0_i32_0 = arith.constant 0 : i32
    %c0_i32_1 = arith.constant 0 : i32
    return %c0_i32, %c0_i32_0 : i32, i32
  }
  func.func @transform_1(%arg0: i32) -> (i32, i32) {
    %c0_i32 = arith.constant 0 : i32
    %c0_i32_0 = arith.constant 0 : i32
    %c0_i32_1 = arith.constant 0 : i32
    return %c0_i32, %c0_i32_0 : i32, i32
  }
  func.func @transform_2(%arg0: i32) -> (i32, i32) {
    %c0_i32 = arith.constant 0 : i32
    %c0_i32_0 = arith.constant 0 : i32
    return %arg0, %c0_i32 : i32, i32
  }
}

</mosaic_0001>

<bundles_post_ra>
// kernel: tpu_custom_call.1
= control target key start
LH: loop header
LB: loop body
LE: loop exit
PB: predicated region body
PF: predicated region fallthrough
CT: control target
= control target key end

     0   :  { %7 = vsyncpa [#allocation3], 0  ;;  %s700_s0 = inlined_call_operand.hbm [shape: f32[1,128], index: 0, kind: input, shape index: {}]   ;;  %s701_s1 = inlined_call_operand.hbm [shape: f32[1,128], index: 1, kind: input, shape index: {}]   ;;  %s702_s2 = inlined_call_operand.hbm [shape: f32[16,128], index: 2, kind: output, shape index: {}]  }
   0x1   :  { %8 = vsyncpa [#allocation6], 0 }
   0x2   :  { %9 = vsyncpa [#allocation4], 0  ;;  %s15_s11 = sshll.u32 %s700_s0, 4  ;;  %s491_s12 = smov [#allocation2]   ;;  %s16_s11 = int_to_ptr.hbm [resolvable:$true] %s15_s11 }
   0x3   :  { %s17_s13 = sshll.u32 %s491_s12, 4  ;;  %s26_s16 = sshll.u32 %s701_s1, 4  ;;  %s18_s13 = int_to_ptr.vmem [resolvable:$true] %s17_s13  ;;  %s27_s16 = int_to_ptr.hbm [resolvable:$true] %s26_s16 }
   0x4   :  { %20 = dma.hbm_to_vmem [thread:$0]  %s16_s11, 16, %s18_s13, [#allocation3]  }
   0x5   :  { %s492_s17 = smov [#allocation5]  }
   0x6   :  { %s28_s18 = sshll.u32 %s492_s17, 4  ;;  %s29_s18 = int_to_ptr.vmem [resolvable:$true] %s28_s18 }
   0x7   :  { %31 = dma.hbm_to_vmem [thread:$0]  %s27_s16, 16, %s29_s18, [#allocation6]  }
   0x8   :  { %485 = dma.done.wait [#allocation3], 16  }
   0x9   :  { %486 = vsyncadd [#allocation3], 4294967280 }
   0xa   :  { %487 = dma.done.wait [#allocation6], 16  }
   0xb   :  { %488 = vsyncadd [#allocation6], 4294967280  ;;  %v40_v0 = vlaneseq  ;;  %v411_v5 = vld [vmem:[#allocation2] ss:$0 sm:$0xff]  ;;  %v412_v6 = vld [vmem:[#allocation5] ss:$0 sm:$0xff] }
   0xc   :  { %v493_v32 = vmov 683565275   ;;  %v494_v34 = vmov 2475754826   ;;  %v495_v36 = vmov 2131351028  }
   0xd   :  { %v41_v1 = vshrl.u32 %v40_v0, 7  ;;  %v496_v38 = vmov 2102212464   ;;  %v497_v40 = vmov 920167782   ;;  %s500_s0 = smov [#allocation7]  }
   0xe   :  { %v498_v49 = vmov 1326507024   ;;  %s377_s1 = sshll.u32 %s500_s0, 4  ;;  %s379_s21 = sshll.u32 %s702_s2, 4  ;;  %s378_s1 = int_to_ptr.vmem [resolvable:$true] %s377_s1  ;;  %s380_s21 = int_to_ptr.hbm [resolvable:$true] %s379_s21 }
   0xf   :  { %v42_v2 = vadd.s32 8, %v41_v1  ;;  %v47_v3 = vcvt.s32.f32 %v41_v1  ;;  %s501_s22 = smov 128   ;;  %s502_s23 = smov 8  }
  0x11   :  { %v48_v4 = vcvt.s32.f32 %v42_v2  ;;  %v53_v7 = vmul.f32 %v411_v5, %v47_v3 }
  0x13   :  { %v54_v8 = vmul.f32 %v411_v5, %v48_v4  ;;  %v524_v9 = vadd.f32 %v412_v6, %v53_v7 }
  0x15   :  { %v526_v10 = vadd.f32 %v412_v6, %v54_v8  ;;  %v61_v11 = vand.u32 2147483647, %v524_v9  ;;  %v64_v12 = vand.u32 2139095040, %v524_v9 }
  0x17   :  { %v216_v13 = vand.u32 2147483647, %v526_v10  ;;  %v219_v14 = vand.u32 2139095040, %v526_v10  ;;  %v65_v15 = vshrl.u32 %v64_v12, 23  ;;  %v68_v16 = vand.u32 8388607, %v61_v11 }
  0x19   :  { %v220_v17 = vshrl.u32 %v219_v14, 23  ;;  %v393_v18 = vadd.s32 4294967169, %v65_v15  ;;  %v69_v19 = vor.u32 8388608, %v68_v16  ;;  %v223_v21 = vand.u32 8388607, %v216_v13 }
  0x1b   :  { %v396_v20 = vadd.s32 4294967169, %v220_v17  ;;  %v71_v22 = vadd.s32 1, %v393_v18  ;;  %v536_v25 = vshll.u32 %v69_v19, 8  ;;  %v224_v26 = vor.u32 8388608, %v223_v21 }
  0x1d   :  { %v226_v23 = vadd.s32 1, %v396_v20  ;;  %vm72_vm0 = vcmp.gt.s32.totalorder %v71_v22, 0  ;;  %v110_v42 = vand.u32 65535, %v536_v25  ;;  %v546_v43 = vshll.u32 %v224_v26, 8 }
  0x1e   :  { %v73_v24 = vsel %vm72_vm0, %v71_v22, 0  ;;  %v111_v47 = vshrl.u32 %v536_v25, 16 }
  0x1f   :  { %vm227_vm1 = vcmp.gt.s32.totalorder %v226_v23, 0  ;;  %v75_v27 = vand.u32 31, %v73_v24  ;;  %v538_v29 = vshrl.u32 %v73_v24, 5 }
  0x20   :  { %v228_v28 = vsel %vm227_vm1, %v226_v23, 0 }
  0x21   :  { %v540_v30 = vand.u32 31, %v228_v28  ;;  %v76_v31 = vsub.s32 32, %v75_v27  ;;  %v78_v33 = vshll.u32 %v493_v32, %v75_v27  ;;  %v81_v35 = vshll.u32 %v494_v34, %v75_v27 }
  0x22   :  { %v84_v37 = vshll.u32 %v495_v36, %v75_v27  ;;  %v87_v39 = vshll.u32 %v496_v38, %v75_v27  ;;  %v90_v41 = vshll.u32 %v497_v40, %v75_v27  ;;  %vm93_vm2 = vcmp.lt.s32.totalorder %v538_v29, 1 }
  0x23   :  { %v79_v44 = vshrl.u32 %v494_v34, %v76_v31  ;;  %v82_v45 = vshrl.u32 %v495_v36, %v76_v31  ;;  %v85_v46 = vshrl.u32 %v496_v38, %v76_v31  ;;  %v88_v48 = vshrl.u32 %v497_v40, %v76_v31 }
  0x24   :  { %v91_v50 = vshrl.u32 %v498_v49, %v76_v31  ;;  %vm96_vm3 = vcmp.lt.s32.totalorder %v538_v29, 4  ;;  %v555_v54 = vsub.s32 32, %v540_v30  ;;  %v77_v55 = vshrl.u32 %v493_v32, %v76_v31 }
  0x25   :  { %v80_v51 = vor.u32 %v79_v44, %v78_v33  ;;  %v83_v52 = vor.u32 %v82_v45, %v81_v35  ;;  %v86_v53 = vor.u32 %v85_v46, %v84_v37  ;;  %v89_v56 = vor.u32 %v88_v48, %v87_v39 }
  0x26   :  { %v92_v57 = vor.u32 %v91_v50, %v90_v41  ;;  %vm95_vm4 = vcmp.lt.s32.totalorder %v538_v29, 3  ;;  %vm94_vm5 = vcmp.lt.s32.totalorder %v538_v29, 2  ;;  %v564_v60 = vshrl.u32 %v228_v28, 5 }
  0x27   :  { %v101_v58 = vsel %vm93_vm2, %v80_v51, %v83_v52  ;;  %v105_v59 = vsel %vm93_vm2, %v83_v52, %v86_v53  ;;  %v102_v61 = vsel %vm96_vm3, %v89_v56, 920167782  ;;  %v233_v63 = vshll.u32 %v493_v32, %v540_v30 }
  0x28   :  { %v106_v62 = vsel %vm96_vm3, %v92_v57, 1326507024  ;;  %v236_v0 = vshll.u32 %v494_v34, %v540_v30  ;;  %v98_v1 = vsel %vm96_vm3, %v86_v53, 2102212464  ;;  %v103_v2 = vsel %vm95_vm4, %v86_v53, %v102_v61 }
  0x29   :  { %v107_v3 = vsel %vm95_vm4, %v89_v56, %v106_v62  ;;  %v234_v4 = vshrl.u32 %v494_v34, %v555_v54  ;;  %v97_v5 = vsel %vm93_vm2, %v77_v55, %v80_v51  ;;  %v104_v6 = vsel %vm94_vm5, %v101_v58, %v103_v2 }
  0x2a   :  { %v108_v7 = vsel %vm94_vm5, %v105_v59, %v107_v3  ;;  %v237_v8 = vshrl.u32 %v495_v36, %v555_v54  ;;  %v134_v15 = vand.u32 65535, %v104_v6  ;;  %v135_v16 = vshrl.u32 %v104_v6, 16 }
  0x2b   :  { %v112_v12 = vand.u32 65535, %v108_v7  ;;  %v113_v14 = vshrl.u32 %v108_v7, 16  ;;  %v99_v17 = vsel %vm95_vm4, %v83_v52, %v98_v1  ;;  %v589_v18 = vor.u32 %v234_v4, %v233_v63 }
  0x2c   :  { %v591_v19 = vor.u32 %v237_v8, %v236_v0  ;;  %v239_v20 = vshll.u32 %v495_v36, %v540_v30  ;;  %v240_v24 = vshrl.u32 %v496_v38, %v555_v54  ;;  %v136_v27 = vmul.u32 %v134_v15, %v110_v42 }
  0x2d   :  { %v114_v21 = vmul.u32 %v112_v12, %v110_v42  ;;  %v115_v22 = vmul.u32 %v113_v14, %v110_v42  ;;  %v116_v23 = vmul.u32 %v112_v12, %v111_v47  ;;  %v117_v26 = vmul.u32 %v113_v14, %v111_v47 }
  0x2e   :  { %v137_v28 = vmul.u32 %v135_v16, %v110_v42  ;;  %v138_v31 = vmul.u32 %v134_v15, %v111_v47  ;;  %v139_v37 = vmul.u32 %v135_v16, %v111_v47  ;;  %v242_v48 = vshll.u32 %v496_v38, %v540_v30 }
  0x2f   :  { %v118_v33 = vshll.u32 %v115_v22, 16  ;;  %v119_v34 = vshrl.u32 %v115_v22, 16  ;;  %v120_v35 = vshll.u32 %v116_v23, 16  ;;  %v121_v39 = vshrl.u32 %v116_v23, 16 }
  0x30   :  { %v140_v41 = vshll.u32 %v137_v28, 16  ;;  %v141_v44 = vshrl.u32 %v137_v28, 16  ;;  %v142_v45 = vshll.u32 %v138_v31, 16  ;;  %v143_v46 = vshrl.u32 %v138_v31, 16 }
  0x31   :  { %vm122_vm6 = vc.u32 %v114_v21, %v118_v33  ;;  %v124_v36 = vadd.s32 %v118_v33, %v114_v21  ;;  %v499_v50 = vmov 0   ;;  %v243_v52 = vshrl.u32 %v497_v40, %v555_v54 }
  0x32   :  { %v123_v51 = vsel %vm122_vm6, 1, %v499_v50  ;;  %vm144_vm7 = vc.u32 %v136_v27, %v140_v41  ;;  %v146_v42 = vadd.s32 %v140_v41, %v136_v27  ;;  %v245_v55 = vshll.u32 %v497_v40, %v540_v30 }
  0x33   :  { %v125_v53 = vadd.s32 %v123_v51, %v117_v26  ;;  %vm126_vm8 = vc.u32 %v124_v36, %v120_v35  ;;  %v145_v47 = vsel %vm144_vm7, 1, %v499_v50  ;;  %v241_v38 = vor.u32 %v240_v24, %v239_v20 }
  0x34   :  { %v127_v56 = vsel %vm126_vm8, 1, %v499_v50  ;;  %v147_v57 = vadd.s32 %v145_v47, %v139_v37  ;;  %vm148_vm9 = vc.u32 %v146_v42, %v142_v45  ;;  %v244_v61 = vor.u32 %v243_v52, %v242_v48 }
  0x35   :  { %v129_v58 = vadd.s32 %v127_v56, %v125_v53  ;;  %v149_v59 = vsel %vm148_vm9, 1, %v499_v50  ;;  %v246_v62 = vshrl.u32 %v498_v49, %v555_v54  ;;  %v608_v63 = vadd.s32 %v146_v42, %v142_v45 }
  0x36   :  { %v151_v0 = vadd.s32 %v149_v59, %v147_v57  ;;  %vm248_vm10 = vcmp.lt.s32.totalorder %v564_v60, 1  ;;  %vm250_vm11 = vcmp.lt.s32.totalorder %v564_v60, 3  ;;  %vm249_vm12 = vcmp.lt.s32.totalorder %v564_v60, 2 }
  0x37   :  { %v130_v30 = vadd.s32 %v129_v58, %v119_v34  ;;  %v247_v40 = vor.u32 %v246_v62, %v245_v55  ;;  %vm251_vm13 = vcmp.lt.s32.totalorder %v564_v60, 4  ;;  %v100_v1 = vsel %vm94_vm5, %v97_v5, %v99_v17 }
  0x38   :  { %v152_v2 = vadd.s32 %v151_v0, %v141_v44  ;;  %v256_v49 = vsel %vm248_vm10, %v589_v18, %v591_v19  ;;  %v257_v3 = vsel %vm251_vm13, %v244_v61, 920167782  ;;  %v260_v7 = vsel %vm248_vm10, %v591_v19, %v241_v38 }
  0x39   :  { %v622_v4 = vadd.s32 %v130_v30, %v121_v39  ;;  %v258_v6 = vsel %vm250_vm11, %v241_v38, %v257_v3  ;;  %v265_v29 = vand.u32 65535, %v546_v43  ;;  %v261_v12 = vsel %vm251_vm13, %v247_v40, 1326507024 }
  0x3a   :  { %v153_v5 = vadd.s32 %v152_v2, %v143_v46  ;;  %v259_v8 = vsel %vm249_vm12, %v256_v49, %v258_v6  ;;  %v266_v14 = vshrl.u32 %v546_v43, 16  ;;  %v154_v15 = vmul.u32 %v536_v25, %v100_v1 }
  0x3b   :  { %vm156_vm14 = vc.u32 %v622_v4, %v608_v63  ;;  %v262_v16 = vsel %vm250_vm11, %v244_v61, %v261_v12  ;;  %v289_v17 = vand.u32 65535, %v259_v8  ;;  %v290_v22 = vshrl.u32 %v259_v8, 16 }
  0x3c   :  { %v157_v20 = vadd.s32 1, %v153_v5  ;;  %v263_v21 = vsel %vm249_vm12, %v260_v7, %v262_v16  ;;  %v232_v27 = vshrl.u32 %v493_v32, %v555_v54  ;;  %v253_v44 = vsel %vm251_vm13, %v241_v38, 2102212464 }
  0x3d   :  { %v267_v23 = vand.u32 65535, %v263_v21  ;;  %v268_v24 = vshrl.u32 %v263_v21, 16  ;;  %v292_v28 = vmul.u32 %v290_v22, %v265_v29  ;;  %v293_v25 = vmul.u32 %v289_v17, %v266_v14 }
  0x3e   :  { %v158_v26 = vsel %vm156_vm14, %v157_v20, %v153_v5  ;;  %v291_v35 = vmul.u32 %v289_v17, %v265_v29  ;;  %v252_v46 = vsel %vm248_vm10, %v232_v27, %v589_v18  ;;  %v294_v32 = vmul.u32 %v290_v22, %v266_v14 }
  0x3f   :  { %v159_v31 = vadd.s32 %v158_v26, %v154_v15  ;;  %v269_v33 = vmul.u32 %v267_v23, %v265_v29  ;;  %v270_v34 = vmul.u32 %v268_v24, %v265_v29  ;;  %v271_v37 = vmul.u32 %v267_v23, %v266_v14 }
  0x40   :  { %v295_v39 = vshll.u32 %v292_v28, 16  ;;  %v272_v45 = vmul.u32 %v268_v24, %v266_v14  ;;  %v297_v54 = vshll.u32 %v293_v25, 16  ;;  %v254_v52 = vsel %vm250_vm11, %v591_v19, %v253_v44 }
  0x41   :  { %v160_v41 = vadd.s32 536870912, %v159_v31  ;;  %v273_v36 = vshll.u32 %v270_v34, 16  ;;  %v275_v48 = vshll.u32 %v271_v37, 16  ;;  %v274_v18 = vshrl.u32 %v270_v34, 16 }
  0x42   :  { %vm299_vm0 = vc.u32 %v291_v35, %v295_v39  ;;  %v301_v55 = vadd.s32 %v295_v39, %v291_v35  ;;  %v296_v58 = vshrl.u32 %v292_v28, 16  ;;  %v276_v62 = vshrl.u32 %v271_v37, 16 }
  0x43   :  { %v649_v51 = vshrl.u32 %v160_v41, 30  ;;  %vm277_vm15 = vc.u32 %v269_v33, %v273_v36  ;;  %v279_v42 = vadd.s32 %v273_v36, %v269_v33  ;;  %v300_v47 = vsel %vm299_vm0, 1, %v499_v50 }
  0x44   :  { %v278_v53 = vsel %vm277_vm15, 1, %v499_v50  ;;  %v302_v59 = vadd.s32 %v300_v47, %v294_v32  ;;  %vm303_vm2 = vc.u32 %v301_v55, %v297_v54  ;;  %v298_v30 = vshrl.u32 %v293_v25, 16 }
  0x45   :  { %v162_v56 = vshll.u32 %v649_v51, 30  ;;  %v280_v57 = vadd.s32 %v278_v53, %v272_v45  ;;  %vm281_vm1 = vc.u32 %v279_v42, %v275_v48  ;;  %v304_v19 = vsel %vm303_vm2, 1, %v499_v50 }
  0x46   :  { %v282_v38 = vsel %vm281_vm1, 1, %v499_v50  ;;  %v306_v40 = vadd.s32 %v304_v19, %v302_v59  ;;  %v305_v49 = vadd.s32 %v301_v55, %v297_v54  ;;  %v255_v3 = vsel %vm249_vm12, %v252_v46, %v254_v52 }
  0x47   :  { %v163_v61 = vsub.s32 %v159_v31, %v162_v56  ;;  %v284_v0 = vadd.s32 %v282_v38, %v280_v57  ;;  %v309_v12 = vmul.u32 %v546_v43, %v255_v3  ;;  %v155_v50 = vadd.s32 %v608_v63, %v622_v4 }
  0x48   :  { %v307_v6 = vadd.s32 %v306_v40, %v296_v58  ;;  %v185_v37 = vsub.s32 4, %v649_v51  ;;  %vm63_vm7 = vcmp.lt.s32.totalorder %v524_v9, 0  ;;  %vm671_vm8 = vcmp.le.f32.partialorder %v61_v11, 0.7853982 }
  0x49   :  { %vm164_vm3 = vcmp.lt.s32.totalorder %v163_v61, 0  ;;  %v165_v1 = vsub.s32 0, %v163_v61  ;;  %v285_v2 = vadd.s32 %v284_v0, %v274_v18  ;;  %vm218_vm11 = vcmp.lt.s32.totalorder %v526_v10, 0 }
  0x4a   :  { %v308_v8 = vadd.s32 %v307_v6, %v298_v30  ;;  %v186_v46 = vsel %vm63_vm7, %v185_v37, %v649_v51  ;;  %vm685_vm13 = vcmp.le.f32.partialorder %v216_v13, 0.7853982  ;;  %vm204_vm15 = vweird.f32 %v524_v9 }
  0x4b   :  { %v166_v7 = vsel %vm164_vm3, %v165_v1, %v163_v61  ;;  %v286_v29 = vadd.s32 %v285_v2, %v276_v62  ;;  %v188_v52 = vsel %vm671_vm8, 0, %v186_v46  ;;  %vm359_vm3 = vweird.f32 %v526_v10 }
  0x4c   :  { %v167_v5 = vclz %v166_v7  ;;  %v312_v15 = vadd.s32 1, %v308_v8  ;;  %v205_v58 = vadd.s32 3, %v188_v52 }
  0x4d   :  { %vm311_vm4 = vc.u32 %v286_v29, %v305_v49  ;;  %v310_v42 = vadd.s32 %v305_v49, %v286_v29 }
  0x4e   :  { %v394_v14 = vadd.s32 4294967294, %v167_v5  ;;  %v313_v16 = vsel %vm311_vm4, %v312_v15, %v308_v8  ;;  %v206_v1 = vand.u32 3, %v205_v58 }
  0x4f   :  { %v314_v20 = vadd.s32 %v313_v16, %v309_v12 }
  0x50   :  { %vm395_vm5 = vcmp.lt.s32.totalorder %v394_v14, 0  ;;  %vm211_vm10 = vcmp.eq.s32.totalorder %v206_v1, 2  ;;  %vm208_vm12 = vcmp.eq.s32.totalorder %v206_v1, 0  ;;  %vm207_vm14 = vcmp.lt.s32.totalorder %v206_v1, 2 }
  0x51   :  { %v170_v17 = vsel %vm395_vm5, 0, %v394_v14  ;;  %v315_v23 = vadd.s32 536870912, %v314_v20 }
  0x52   :  { %v171_v21 = vsub.s32 32, %v170_v17  ;;  %v172_v60 = vshll.u32 %v163_v61, %v170_v17  ;;  %v175_v22 = vsub.s32 4294967266, %v170_v17 }
  0x53   :  { %v664_v27 = vshrl.u32 %v315_v23, 30 }
  0x54   :  { %v173_v24 = vshrl.u32 %v155_v50, %v171_v21  ;;  %v176_v26 = vadd.s32 127, %v175_v22 }
  0x55   :  { %v317_v25 = vshll.u32 %v664_v27, 30  ;;  %v340_v15 = vsub.s32 4, %v664_v27 }
  0x56   :  { %v174_v28 = vor.u32 %v173_v24, %v172_v60  ;;  %v177_v43 = vshll.u32 %v176_v26, 23 }
  0x57   :  { %v318_v34 = vsub.s32 %v314_v20, %v317_v25  ;;  %v341_v22 = vsel %vm218_vm11, %v340_v15, %v664_v27 }
  0x58   :  { %v178_v31 = vor.u32 4788187, %v177_v43  ;;  %v181_v33 = vcvt.s32.f32 %v174_v28  ;;  %v343_v28 = vsel %vm685_vm13, 0, %v341_v22 }
  0x59   :  { %vm319_vm6 = vcmp.lt.s32.totalorder %v318_v34, 0  ;;  %v320_v4 = vsub.s32 0, %v318_v34 }
  0x5a   :  { %v179_v63 = vand.u32 2147483647, %v178_v31 }
  0x5b   :  { %v321_v39 = vsel %vm319_vm6, %v320_v4, %v318_v34 }
  0x5c   :  { %v182_v35 = vmul.f32 %v181_v33, %v179_v63  ;;  %v322_v45 = vclz %v321_v39 }
  0x5e   :  { %v183_v44 = vxor.u32 2147483648, %v182_v35  ;;  %v397_v48 = vadd.s32 4294967294, %v322_v45 }
  0x60   :  { %v184_v36 = vsel %vm63_vm7, %v183_v44, %v182_v35  ;;  %vm398_vm9 = vcmp.lt.s32.totalorder %v397_v48, 0 }
  0x61   :  { %v187_v32 = vsel %vm671_vm8, %v524_v9, %v184_v36  ;;  %v325_v11 = vsel %vm398_vm9, 0, %v397_v48  ;;  %v360_v9 = vadd.s32 3, %v343_v28 }
  0x62   :  { %v189_v54 = vmul.f32 %v187_v32, %v187_v32  ;;  %v326_v55 = vsub.s32 32, %v325_v11  ;;  %v327_v56 = vshll.u32 %v318_v34, %v325_v11  ;;  %v330_v18 = vsub.s32 4294967266, %v325_v11 }
  0x63   :  { %v361_v35 = vand.u32 3, %v360_v9 }
  0x64   :  { %v190_v53 = vmul.f32 -0.001358992, %v189_v54  ;;  %v197_v47 = vmul.f32 -0.00019511016, %v189_v54  ;;  %v328_v51 = vshrl.u32 %v310_v42, %v326_v55  ;;  %v331_v59 = vadd.s32 127, %v330_v18 }
  0x65   :  { %vm366_vm0 = vcmp.eq.s32.totalorder %v361_v35, 2  ;;  %vm363_vm1 = vcmp.eq.s32.totalorder %v361_v35, 0  ;;  %vm362_vm2 = vcmp.lt.s32.totalorder %v361_v35, 2 }
  0x66   :  { %v191_v57 = vadd.f32 0.041655596, %v190_v53  ;;  %v198_v38 = vadd.f32 0.008332121, %v197_v47  ;;  %v329_v0 = vor.u32 %v328_v51, %v327_v56  ;;  %v332_v19 = vshll.u32 %v331_v59, 23 }
  0x68   :  { %v192_v61 = vmul.f32 %v191_v57, %v189_v54  ;;  %v199_v62 = vmul.f32 %v198_v38, %v189_v54  ;;  %v333_v2 = vor.u32 4788187, %v332_v19  ;;  %v336_v49 = vcvt.s32.f32 %v329_v0 }
  0x6a   :  { %v193_v30 = vadd.f32 -0.4999988, %v192_v61  ;;  %v200_v40 = vadd.f32 -0.16666654, %v199_v62  ;;  %v334_v7 = vand.u32 2147483647, %v333_v2 }
  0x6c   :  { %v194_v3 = vmul.f32 %v193_v30, %v189_v54  ;;  %v201_v6 = vmul.f32 %v200_v40, %v189_v54  ;;  %v337_v8 = vmul.f32 %v336_v49, %v334_v7 }
  0x6e   :  { %v195_v29 = vadd.f32 1.0, %v194_v3  ;;  %v202_v5 = vadd.f32 1.0, %v201_v6  ;;  %v338_v16 = vxor.u32 2147483648, %v337_v8 }
  0x70   :  { %v203_v12 = vmul.f32 %v202_v5, %v187_v32  ;;  %v212_v14 = vxor.u32 2147483648, %v195_v29  ;;  %v339_v21 = vsel %vm218_vm11, %v338_v16, %v337_v8 }
  0x71   :  { %v342_v23 = vsel %vm685_vm13, %v526_v10, %v339_v21 }
  0x72   :  { %v209_v17 = vxor.u32 2147483648, %v203_v12  ;;  %v213_v20 = vsel %vm211_vm10, %v212_v14, %v203_v12  ;;  %v344_v26 = vmul.f32 %v342_v23, %v342_v23 }
  0x74   :  { %v210_v60 = vsel %vm208_vm12, %v195_v29, %v209_v17  ;;  %v345_v43 = vmul.f32 -0.001358992, %v344_v26  ;;  %v352_v25 = vmul.f32 -0.00019511016, %v344_v26 }
  0x75   :  { %v214_v24 = vsel %vm207_vm14, %v210_v60, %v213_v20 }
  0x76   :  { %v215_v13 = vsel %vm204_vm15, nan, %v214_v24  ;;  %v346_v31 = vadd.f32 0.041655596, %v345_v43  ;;  %v353_v33 = vadd.f32 0.008332121, %v352_v25 }
  0x77   :  { %371 = vst [vmem:[#allocation7] sm:$0xff] %v215_v13 }
  0x78   :  { %v347_v34 = vmul.f32 %v346_v31, %v344_v26  ;;  %v354_v63 = vmul.f32 %v353_v33, %v344_v26 }
  0x7a   :  { %v348_v4 = vadd.f32 -0.4999988, %v347_v34  ;;  %v355_v27 = vadd.f32 -0.16666654, %v354_v63 }
  0x7c   :  { %v349_v37 = vmul.f32 %v348_v4, %v344_v26  ;;  %v356_v39 = vmul.f32 %v355_v27, %v344_v26 }
  0x7e   :  { %v350_v41 = vadd.f32 1.0, %v349_v37  ;;  %v357_v44 = vadd.f32 1.0, %v356_v39 }
  0x80   :  { %v358_v45 = vmul.f32 %v357_v44, %v342_v23  ;;  %v367_v36 = vxor.u32 2147483648, %v350_v41 }
  0x82   :  { %v364_v46 = vxor.u32 2147483648, %v358_v45  ;;  %v368_v48 = vsel %vm366_vm0, %v367_v36, %v358_v45 }
  0x84   :  { %v365_v32 = vsel %vm363_vm1, %v350_v41, %v364_v46 }
  0x85   :  { %v369_v54 = vsel %vm362_vm2, %v365_v32, %v368_v48 }
  0x86   :  { %v370_v42 = vsel %vm359_vm3, nan, %v369_v54 }
  0x87   :  { %372 = vst [vmem:[#allocation7 + $0x8] sm:$0xff] %v370_v42 }
  0x88   :  { %385 = dma.vmem_to_hbm [thread:$0]  %s378_s1, 256, %s380_s21, [#allocation4], %s501_s22, %s501_s22, %s502_s23  }
  0x89   :  { %489 = dma.done.wait [#allocation4], 256  }
  0x8a   :  { %490 = vsyncadd [#allocation4], 4294967040 }
  0x8b   :  { %390 = vsyncpa [#allocation3], 1 }
  0x8c   :  { %391 = vsyncpa [#allocation6], 1 }
  0x8d   :  { %392 = vsyncpa [#allocation4], 1 }

</bundles_post_ra>
